<compile_context>
chip_gen: v7x
topology: tpu7x:2x2x1
jax: 0.10.0
libtpu: 0.0.40
codegen_flags: <defaults>
</compile_context>

<pallas_src>
import functools

import jax
import jax.numpy as jnp
from jax.experimental import pallas as pl
from jax.experimental.pallas import tpu as pltpu

_EPS = 1e-5


# ------------------------------- kernels ------------------------------------


def _sage_layer_kernel(adj_ref, xagg_ref, xroot_ref, wl_ref, wr_ref, b_ref, o_ref,
                       *, softmax_cols):
    """Fused SAGEConv layer on one row tile.

    adj_ref   : (TILE_M, N_pad)  bf16   pre-normalized adjacency rows (adj * 1/deg)
    xagg_ref  : (N_pad, C_in)    bf16   full node features (aggregation operand)
    xroot_ref : (TILE_M, C_in)   f32    this tile's node features (root/self path)
    wl_ref    : (C_in, C_out)    f32    BN-folded neighbor weight
    wr_ref    : (C_in, C_out)    f32    BN-folded root weight
    b_ref     : (1, C_out)       f32    BN-folded bias
    o_ref     : (TILE_M, C_out)  f32    relu(h)  or  log_softmax(h) if softmax_cols
    """
    # mean-neighbor aggregation (degree normalization pre-folded into adj): MXU, bf16.
    agg = jnp.dot(adj_ref[...], xagg_ref[...], preferred_element_type=jnp.float32)
    # SAGEConv projection (BatchNorm already folded into wl/wr/b for hidden layers).
    h = (jnp.dot(agg, wl_ref[...], preferred_element_type=jnp.float32)
         + jnp.dot(xroot_ref[...], wr_ref[...], preferred_element_type=jnp.float32)
         + b_ref[...])
    if softmax_cols is None:
        o_ref[...] = jnp.maximum(h, 0.0)
    else:
        # mask padded lanes out of the softmax, numerically-stable log_softmax
        col = jax.lax.broadcasted_iota(jnp.int32, h.shape, 1)
        h = jnp.where(col < softmax_cols, h, -1e30)
        m = jnp.max(h, axis=-1, keepdims=True)
        z = h - m
        lse = jnp.log(jnp.sum(jnp.exp(z), axis=-1, keepdims=True))
        o_ref[...] = z - lse


# ------------------------------ wrappers -------------------------------------


def _round_up(x, m):
    return (x + m - 1) // m * m


def _pick_tile_m(n_rounded, budget_bytes=40 << 20):
    """Largest row tile (multiple of 8, <=512) whose double-buffered bf16 adjacency
    block fits the VMEM budget (sized conservatively for v7x's 64 MiB VMEM)."""
    tile = min(512, _round_up(n_rounded, 8))
    tile = max(8, tile - tile % 8)
    while tile > 8 and (2 * tile * n_rounded * 2 + (4 << 20)) > budget_bytes:
        tile = max(8, (tile // 2) - (tile // 2) % 8)
    return tile


def _sage_layer(adj_nb, x_agg, x_root, wl, wr, b, *, tile_m, softmax_cols=None):
    n_pad = adj_nb.shape[0]
    c_in, c_out = wl.shape
    grid = (n_pad // tile_m,)

    flops = 2 * n_pad * n_pad * c_in + 2 * 2 * n_pad * c_in * c_out
    transcend = n_pad * c_out if softmax_cols is not None else 0
    bytes_acc = (adj_nb.size * 2 + x_agg.size * 2 + x_root.size * 4
                 + (wl.size + wr.size + b.size) * 4 + n_pad * c_out * 4)
    vmem_bytes = (2 * tile_m * n_pad * 2        # adjacency row tile, double-buffered, bf16
                  + 2 * n_pad * c_in * 2        # resident x (bf16)
                  + 2 * tile_m * c_in * 4       # root x tile (f32)
                  + 2 * (wl.size + wr.size + b.size) * 4
                  + 2 * tile_m * c_out * 4)     # output tile (f32)
    vmem_limit = int(min(max(2 * vmem_bytes, 16 << 20), 64 << 20))

    return pl.pallas_call(
        functools.partial(_sage_layer_kernel, softmax_cols=softmax_cols),
        out_shape=jax.ShapeDtypeStruct((n_pad, c_out), jnp.float32),
        grid=grid,
        in_specs=[
            pl.BlockSpec((tile_m, n_pad), lambda i: (i, 0)),   # adj rows (streamed)
            pl.BlockSpec((n_pad, c_in), lambda i: (0, 0)),     # full x (resident)
            pl.BlockSpec((tile_m, c_in), lambda i: (i, 0)),    # root x tile
            pl.BlockSpec((c_in, c_out), lambda i: (0, 0)),     # Wl (resident)
            pl.BlockSpec((c_in, c_out), lambda i: (0, 0)),     # Wr (resident)
            pl.BlockSpec((1, c_out), lambda i: (0, 0)),        # bias (resident)
        ],
        out_specs=pl.BlockSpec((tile_m, c_out), lambda i: (i, 0)),
        compiler_params=pltpu.CompilerParams(
            dimension_semantics=("parallel",),
            vmem_limit_bytes=vmem_limit),
        cost_estimate=pl.CostEstimate(flops=int(flops),
                                      transcendentals=int(transcend),
                                      bytes_accessed=int(bytes_acc)),
    )(adj_nb, x_agg, x_root, wl, wr, b)


def _pad2d(a, rows, cols):
    return jnp.zeros((rows, cols), a.dtype).at[:a.shape[0], :a.shape[1]].set(a)


def sage_forward(x, adj, convs, bns, *, tile_m=None):
    """Full SAGE forward (eval mode) with Pallas layer kernels."""
    n, _ = x.shape
    out_c = convs[-1]["wl"].shape[1]

    # --- fold eval-mode BatchNorm into the hidden conv weights/bias (wrapper-side) ---
    folded = []
    for li, c in enumerate(convs):
        wl, wr, b = c["wl"], c["wr"], c["b"]
        if li < len(convs) - 1:
            bn = bns[li]
            scale = bn["gamma"] * jax.lax.rsqrt(bn["rvar"] + _EPS)   # (1, C_out)
            wl = wl * scale
            wr = wr * scale
            b = (b - bn["rmean"]) * scale + bn["beta"]
        folded.append((wl, wr, b))

    # --- pre-normalize the adjacency once; stream it as bf16 ---
    deg = jnp.sum(adj, axis=-1, keepdims=True)
    adj_norm = adj * jnp.where(deg > 0, 1.0 / deg, 0.0)

    # --- tiling / padding (lane-dense feature dims, row tile sized for VMEM) ---
    n8 = _round_up(n, 8)
    if tile_m is None:
        tile_m = _pick_tile_m(n8)
    tile_m = min(tile_m, n8)
    n_pad = _round_up(n, tile_m)

    adj_p = _pad2d(adj_norm.astype(jnp.bfloat16), n_pad, n_pad)
    x_p = _pad2d(x, n_pad, _round_up(x.shape[1], 128)).astype(jnp.float32)

    for li, (wl, wr, b) in enumerate(folded):
        cin_p = _round_up(wl.shape[0], 128)
        cout_p = _round_up(wl.shape[1], 128)
        wl_p = _pad2d(wl, cin_p, cout_p)
        wr_p = _pad2d(wr, cin_p, cout_p)
        b_p = _pad2d(b, 1, cout_p)
        is_last = li == len(folded) - 1
        x_p = _sage_layer(adj_p, x_p.astype(jnp.bfloat16), x_p,
                          wl_p, wr_p, b_p, tile_m=tile_m,
                          softmax_cols=(wl.shape[1] if is_last else None))
    return x_p[:n, :out_c]


# ------------------------------ references -----------------------------------


def sage_forward_ref_f32(x, adj, convs, bns):
    """Pure-f32 JAX reference (module semantics, no quantization)."""
    def conv(x, c):
        deg = jnp.sum(adj, axis=-1, keepdims=True)
        agg = (adj @ x) * jnp.where(deg > 0, 1.0 / deg, 0.0)
        return agg @ c["wl"] + x @ c["wr"] + c["b"]
    for li in range(len(convs) - 1):
        h = conv(x, convs[li])
        bn = bns[li]
        h = (h - bn["rmean"]) * jax.lax.rsqrt(bn["rvar"] + _EPS) * bn["gamma"] + bn["beta"]
        x = jnp.maximum(h, 0.0)
    return jax.nn.log_softmax(conv(x, convs[-1]), axis=-1)


def sage_forward_ref_matched(x, adj, convs, bns):
    """Reference mirroring the kernel's precision choices (bf16 normalized adjacency and
    bf16 aggregation operand, f32 accumulation / projections / elementwise)."""
    deg = jnp.sum(adj, axis=-1, keepdims=True)
    adj_nb = (adj * jnp.where(deg > 0, 1.0 / deg, 0.0)).astype(jnp.bfloat16)
    def conv(x, c):
        agg = jnp.dot(adj_nb, x.astype(jnp.bfloat16), preferred_element_type=jnp.float32)
        return agg @ c["wl"] + x @ c["wr"] + c["b"]
    for li in range(len(convs) - 1):
        h = conv(x, convs[li])
        bn = bns[li]
        h = (h - bn["rmean"]) * jax.lax.rsqrt(bn["rvar"] + _EPS) * bn["gamma"] + bn["beta"]
        x = jnp.maximum(h, 0.0)
    return jax.nn.log_softmax(conv(x, convs[-1]), axis=-1)


# ------------------------------ params / demo ---------------------------------


def init_sage_params(key, in_channels, hidden_channels, out_channels, num_layers):
    """Deterministic synthetic parameter init (shapes match the PyTorch module;
    linear weights stored pre-transposed as [C_in, C_out])."""
    dims = [in_channels] + [hidden_channels] * (num_layers - 1) + [out_channels]
    convs, bns = [], []
    for li in range(num_layers):
        cin, cout = dims[li], dims[li + 1]
        key, k1, k2, k3 = jax.random.split(key, 4)
        convs.append(dict(
            wl=jax.random.normal(k1, (cin, cout), jnp.float32) * 0.1,
            wr=jax.random.normal(k2, (cin, cout), jnp.float32) * 0.1,
            b=jax.random.normal(k3, (1, cout), jnp.float32) * 0.01,
        ))
        if li < num_layers - 1:
            key, k4, k5, k6, k7 = jax.random.split(key, 5)
            bns.append(dict(
                gamma=1.0 + 0.1 * jax.random.normal(k4, (1, cout), jnp.float32),
                beta=0.1 * jax.random.normal(k5, (1, cout), jnp.float32),
                rmean=0.1 * jax.random.normal(k6, (1, cout), jnp.float32),
                rvar=1.0 + 0.1 * jax.random.uniform(k7, (1, cout), jnp.float32),
            ))
    return convs, bns


if __name__ == "__main__":
    key = jax.random.PRNGKey(0)

    N = 16              # number of graph nodes
    IN_C = 8            # in_channels
    HID = 32            # hidden_channels
    OUT_C = 8           # out_channels
    NUM_LAYERS = 3

    key, kx, ka = jax.random.split(key, 3)
    x = jax.random.normal(kx, (N, IN_C), jnp.float32)
    # dense random binary adjacency (transposed adjacency adj_t), no self loops
    adj = (jax.random.uniform(ka, (N, N), jnp.float32) < 0.3).astype(jnp.float32)
    adj = adj * (1.0 - jnp.eye(N, dtype=jnp.float32))

    convs, bns = init_sage_params(key, IN_C, HID, OUT_C, NUM_LAYERS)

    out = sage_forward(x, adj, convs, bns)
    out = jax.block_until_ready(out)
    assert out.shape == (N, OUT_C)
    assert bool(jnp.all(jnp.isfinite(out)))

    # tight check vs a reference that mirrors the kernel's bf16 aggregation path
    ref_m = sage_forward_ref_matched(x, adj, convs, bns)
    assert jnp.allclose(out, ref_m, atol=2e-3, rtol=2e-3), "mismatch vs matched reference"

    # loose check vs the pure-f32 module reference (bf16 adjacency quantization tolerance)
    ref_f = sage_forward_ref_f32(x, adj, convs, bns)
    assert jnp.allclose(out, ref_f, atol=6e-2, rtol=6e-2), "mismatch vs f32 reference"

    print("KERNEL_OK")
</pallas_src>

<mosaic_0001>
module attributes {stable_mosaic.version = 11 : i64} {
  func.func @_sage_layer_kernel(%arg0: i32, %arg1: memref<16x16xbf16, #tpu.memory_space<vmem>>, %arg2: memref<16x128xbf16, #tpu.memory_space<vmem>>, %arg3: memref<16x128xf32, #tpu.memory_space<vmem>>, %arg4: memref<128x128xf32, #tpu.memory_space<vmem>>, %arg5: memref<128x128xf32, #tpu.memory_space<vmem>>, %arg6: memref<1x128xf32, #tpu.memory_space<vmem>>, %arg7: memref<16x128xf32, #tpu.memory_space<vmem>>) attributes {dimension_semantics = [#tpu.dimension_semantics<parallel>], iteration_bounds = array<i64: 1>, scalar_prefetch = 0 : i64, scratch_operands = 0 : i64, tpu.core_type = #tpu.core_type<tc>, window_params = [{transform_indices = @transform_0, window_bounds = array<i64: 16, 16>}, {pipeline_mode = #tpu.pipeline_mode<synchronous>, transform_indices = @transform_1, window_bounds = array<i64: 16, 128>}, {transform_indices = @transform_2, window_bounds = array<i64: 16, 128>}, {pipeline_mode = #tpu.pipeline_mode<synchronous>, transform_indices = @transform_3, window_bounds = array<i64: 128, 128>}, {pipeline_mode = #tpu.pipeline_mode<synchronous>, transform_indices = @transform_4, window_bounds = array<i64: 128, 128>}, {pipeline_mode = #tpu.pipeline_mode<synchronous>, transform_indices = @transform_5, window_bounds = array<i64: 1, 128>}, {transform_indices = @transform_6, window_bounds = array<i64: 16, 128>}]} {
    %c0 = arith.constant 0 : index
    %c0_0 = arith.constant 0 : index
    %0 = vector.load %arg1[%c0, %c0_0] : memref<16x16xbf16, #tpu.memory_space<vmem>>, vector<16x16xbf16>
    %c0_1 = arith.constant 0 : index
    %c0_2 = arith.constant 0 : index
    %1 = vector.load %arg2[%c0_1, %c0_2] : memref<16x128xbf16, #tpu.memory_space<vmem>>, vector<16x128xbf16>
    %cst = arith.constant dense<0.000000e+00> : vector<16x128xf32>
    %2 = tpu.matmul %0, %1, %cst {dimension_numbers = #tpu.dot_dimension_numbers<[1], [0], [0], [1], [0, 0, 1, 1], [], []>} : vector<16x16xbf16>, vector<16x128xbf16>, vector<16x128xf32> -> vector<16x128xf32>
    %c0_3 = arith.constant 0 : index
    %c0_4 = arith.constant 0 : index
    %3 = vector.load %arg4[%c0_3, %c0_4] : memref<128x128xf32, #tpu.memory_space<vmem>>, vector<128x128xf32>
    %cst_5 = arith.constant dense<0.000000e+00> : vector<16x128xf32>
    %4 = tpu.matmul %2, %3, %cst_5 {dimension_numbers = #tpu.dot_dimension_numbers<[1], [0], [0], [1], [0, 0, 1, 1], [], []>} : vector<16x128xf32>, vector<128x128xf32>, vector<16x128xf32> -> vector<16x128xf32>
    %c0_6 = arith.constant 0 : index
    %c0_7 = arith.constant 0 : index
    %5 = vector.load %arg3[%c0_6, %c0_7] : memref<16x128xf32, #tpu.memory_space<vmem>>, vector<16x128xf32>
    %c0_8 = arith.constant 0 : index
    %c0_9 = arith.constant 0 : index
    %6 = vector.load %arg5[%c0_8, %c0_9] : memref<128x128xf32, #tpu.memory_space<vmem>>, vector<128x128xf32>
    %cst_10 = arith.constant dense<0.000000e+00> : vector<16x128xf32>
    %7 = tpu.matmul %5, %6, %cst_10 {dimension_numbers = #tpu.dot_dimension_numbers<[1], [0], [0], [1], [0, 0, 1, 1], [], []>} : vector<16x128xf32>, vector<128x128xf32>, vector<16x128xf32> -> vector<16x128xf32>
    %8 = arith.addf %4, %7 : vector<16x128xf32>
    %c0_11 = arith.constant 0 : index
    %c0_12 = arith.constant 0 : index
    %9 = vector.load %arg6[%c0_11, %c0_12] : memref<1x128xf32, #tpu.memory_space<vmem>>, vector<1x128xf32>
    %10 = vector.broadcast %9 : vector<1x128xf32> to vector<16x128xf32>
    %11 = arith.addf %8, %10 : vector<16x128xf32>
    %cst_13 = arith.constant 0.000000e+00 : f32
    %12 = vector.broadcast %cst_13 : f32 to vector<16x128xf32>
    %13 = arith.maximumf %11, %12 : vector<16x128xf32>
    %c0_14 = arith.constant 0 : index
    %c0_15 = arith.constant 0 : index
    %14 = vector.load %arg7[%c0_14, %c0_15] : memref<16x128xf32, #tpu.memory_space<vmem>>, vector<16x128xf32>
    tpu.vector_store %arg7[%c0_14, %c0_15], %13 {strides = array<i32>} : memref<16x128xf32, #tpu.memory_space<vmem>>, vector<16x128xf32>,
    return
  }
  func.func @transform_0(%arg0: i32) -> (i32, i32) {
    %c0_i32 = arith.constant 0 : i32
    %c0_i32_0 = arith.constant 0 : i32
    return %arg0, %c0_i32 : i32, i32
  }
  func.func @transform_1(%arg0: i32) -> (i32, i32) {
    %c0_i32 = arith.constant 0 : i32
    %c0_i32_0 = arith.constant 0 : i32
    %c0_i32_1 = arith.constant 0 : i32
    return %c0_i32, %c0_i32_0 : i32, i32
  }
  func.func @transform_2(%arg0: i32) -> (i32, i32) {
    %c0_i32 = arith.constant 0 : i32
    %c0_i32_0 = arith.constant 0 : i32
    return %arg0, %c0_i32 : i32, i32
  }
  func.func @transform_3(%arg0: i32) -> (i32, i32) {
    %c0_i32 = arith.constant 0 : i32
    %c0_i32_0 = arith.constant 0 : i32
    %c0_i32_1 = arith.constant 0 : i32
    return %c0_i32, %c0_i32_0 : i32, i32
  }
  func.func @transform_4(%arg0: i32) -> (i32, i32) {
    %c0_i32 = arith.constant 0 : i32
    %c0_i32_0 = arith.constant 0 : i32
    %c0_i32_1 = arith.constant 0 : i32
    return %c0_i32, %c0_i32_0 : i32, i32
  }
  func.func @transform_5(%arg0: i32) -> (i32, i32) {
    %c0_i32 = arith.constant 0 : i32
    %c0_i32_0 = arith.constant 0 : i32
    %c0_i32_1 = arith.constant 0 : i32
    return %c0_i32, %c0_i32_0 : i32, i32
  }
  func.func @transform_6(%arg0: i32) -> (i32, i32) {
    %c0_i32 = arith.constant 0 : i32
    %c0_i32_0 = arith.constant 0 : i32
    return %arg0, %c0_i32 : i32, i32
  }
}

</mosaic_0001>

<bundles_post_ra>
// kernel: tpu_custom_call.1
= control target key start
LH: loop header
LB: loop body
LE: loop exit
PB: predicated region body
PF: predicated region fallthrough
CT: control target
= control target key end

     0   :  { %11 = vsyncpa [#allocation3], 0  ;;  %s847_s0 = inlined_call_operand.hbm [shape: bf16[16,16], index: 0, kind: input, shape index: {}]   ;;  %s848_s1 = inlined_call_operand.hbm [shape: bf16[16,128], index: 1, kind: input, shape index: {}]   ;;  %s849_s2 = inlined_call_operand.hbm [shape: f32[16,128], index: 2, kind: input, shape index: {}]   ;;  %s850_s3 = inlined_call_operand.hbm [shape: f32[128,128], index: 3, kind: input, shape index: {}]   ;;  %s851_s4 = inlined_call_operand.hbm [shape: f32[128,128], index: 4, kind: input, shape index: {}]   ;;  %s852_s5 = inlined_call_operand.vmem [shape: f32[1,128], index: 5, kind: input, shape index: {}]   ;;  %s853_s6 = inlined_call_operand.hbm [shape: f32[16,128], index: 6, kind: output, shape index: {}]  }
   0x1   :  { %12 = vsyncpa [#allocation6], 0 }
   0x2   :  { %13 = vsyncpa [#allocation9], 0 }
   0x3   :  { %14 = vsyncpa [#allocation4], 0  ;;  %s707_s21 = smov [#allocation5]   ;;  %s567_s25 = scalar_lea.hbm %s848_s1, 128 }
   0x4   :  { %s32_s22 = sshll.u32 %s707_s21, 4  ;;  %p568_p0 = scmp.ne.s32.totalorder %s848_s1, %s567_s25  ;;  %s33_s22 = int_to_ptr.vmem [resolvable:$true] %s32_s22 }
   0x5   :  { %p571_p1 = scmp.lt.u32.totalorder %s567_s25, %s848_s1 }
   0x7   :  { %p573_p2 = pnand %p571_p1, %p568_p0 }
   0x9   :  { %576 = shalt.err (!%p573_p2)
}
   0xa   :  { %s577_s30 = scalar_lea.vmem %s33_s22, 128  ;;  %p582_p4 = scmp.lt.s32.totalorder %s33_s22, %s33_s22 }
   0xb   :  { %p578_p3 = scmp.ne.s32.totalorder %s33_s22, %s577_s30  ;;  %p583_p5 = scmp.lt.s32.totalorder %s577_s30, %s577_s30 }
   0xd   :  { %p584_p6 = por %p583_p5, %p582_p4 }
   0xf   :  { %p585_p7 = pnand %p584_p6, %p578_p3 }
  0x11   :  { %588 = shalt.err (!%p585_p7)
}
  0x12   :  { %s708_s7 = smov 64   ;;  %s709_s8 = smov 4  }
  0x13   :  { %38 = dma.hbm_to_vmem [thread:$0]  %s848_s1, 128, %s33_s22, [#allocation6], %s708_s7, %s708_s7, %s709_s8  }
  0x14   :  { %s710_s11 = smov [#allocation8]   ;;  %s711_s13 = smov [#allocation2]  }
  0x15   :  { %s56_s12 = sshll.u32 %s710_s11, 4  ;;  %s20_s14 = sshll.u32 %s711_s13, 4  ;;  %s57_s12 = int_to_ptr.vmem [resolvable:$true] %s56_s12  ;;  %s21_s14 = int_to_ptr.vmem [resolvable:$true] %s20_s14 }
  0x16   :  { %s589_s17 = scalar_lea.hbm %s850_s3, 2048 }
  0x17   :  { %p590_p8 = scmp.ne.s32.totalorder %s850_s3, %s589_s17  ;;  %p593_p9 = scmp.lt.u32.totalorder %s589_s17, %s850_s3 }
  0x19   :  { %p595_p10 = pnand %p593_p9, %p590_p8 }
  0x1b   :  { %598 = shalt.err (!%p595_p10)
}
  0x1c   :  { %s599_s1 = scalar_lea.vmem %s57_s12, 2048  ;;  %p604_p12 = scmp.lt.s32.totalorder %s57_s12, %s57_s12 }
  0x1d   :  { %p600_p11 = scmp.ne.s32.totalorder %s57_s12, %s599_s1  ;;  %p605_p13 = scmp.lt.s32.totalorder %s599_s1, %s599_s1 }
  0x1f   :  { %p606_p0 = por %p605_p13, %p604_p12 }
  0x21   :  { %p607_p1 = pnand %p606_p0, %p600_p11 }
  0x23   :  { %610 = shalt.err (!%p607_p1)
}
  0x24   :  { %s712_s22 = smov 128   ;;  %s713_s23 = smov 8  }
  0x25   :  { %62 = dma.hbm_to_vmem [thread:$0]  %s850_s3, 2048, %s57_s12, [#allocation9], %s712_s22, %s712_s22, %s713_s23  }
  0x26   :  { %s611_s28 = scalar_lea.hbm %s847_s0, 128 }
  0x27   :  { %p612_p2 = scmp.ne.s32.totalorder %s847_s0, %s611_s28  ;;  %p615_p3 = scmp.lt.u32.totalorder %s611_s28, %s847_s0 }
  0x29   :  { %p617_p4 = pnand %p615_p3, %p612_p2 }
  0x2b   :  { %620 = shalt.err (!%p617_p4)
}
  0x2c   :  { %s621_s11 = scalar_lea.vmem %s21_s14, 128  ;;  %p626_p6 = scmp.lt.s32.totalorder %s21_s14, %s21_s14 }
  0x2d   :  { %p622_p5 = scmp.ne.s32.totalorder %s21_s14, %s621_s11  ;;  %p627_p7 = scmp.lt.s32.totalorder %s621_s11, %s621_s11 }
  0x2f   :  { %p628_p8 = por %p627_p7, %p626_p6 }
  0x31   :  { %p629_p9 = pnand %p628_p8, %p622_p5 }
  0x33   :  { %632 = shalt.err (!%p629_p9)
}
  0x34   :  { %26 = dma.hbm_to_vmem [thread:$0]  %s847_s0, 128, %s21_s14, [#allocation3], %s708_s7, %s708_s7, %s709_s8  }
  0x35   :  { %s714_s13 = smov [#allocation7]   ;;  %s715_s16 = smov [#allocation10]  }
  0x36   :  { %s44_s15 = sshll.u32 %s714_s13, 4  ;;  %s68_s17 = sshll.u32 %s715_s16, 4  ;;  %s45_s15 = int_to_ptr.vmem [resolvable:$true] %s44_s15  ;;  %s69_s17 = int_to_ptr.vmem [resolvable:$true] %s68_s17 }
  0x37   :  { %s633_s20 = scalar_lea.hbm %s849_s2, 256 }
  0x38   :  { %p634_p10 = scmp.ne.s32.totalorder %s849_s2, %s633_s20  ;;  %p637_p11 = scmp.lt.u32.totalorder %s633_s20, %s849_s2 }
  0x3a   :  { %p639_p12 = pnand %p637_p11, %p634_p10 }
  0x3c   :  { %642 = shalt.err (!%p639_p12)
}
  0x3d   :  { %s643_s0 = scalar_lea.vmem %s45_s15, 256  ;;  %p648_p0 = scmp.lt.s32.totalorder %s45_s15, %s45_s15 }
  0x3e   :  { %p644_p13 = scmp.ne.s32.totalorder %s45_s15, %s643_s0  ;;  %p649_p1 = scmp.lt.s32.totalorder %s643_s0, %s643_s0 }
  0x40   :  { %p650_p2 = por %p649_p1, %p648_p0 }
  0x42   :  { %p651_p3 = pnand %p650_p2, %p644_p13 }
  0x44   :  { %654 = shalt.err (!%p651_p3)
}
  0x45   :  { %50 = dma.hbm_to_vmem [thread:$0]  %s849_s2, 256, %s45_s15, [#allocation6], %s712_s22, %s712_s22, %s713_s23  }
  0x46   :  { %s655_s27 = scalar_lea.hbm %s851_s4, 2048 }
  0x47   :  { %p656_p4 = scmp.ne.s32.totalorder %s851_s4, %s655_s27  ;;  %p659_p5 = scmp.lt.u32.totalorder %s655_s27, %s851_s4 }
  0x49   :  { %p661_p6 = pnand %p659_p5, %p656_p4 }
  0x4b   :  { %664 = shalt.err (!%p661_p6)
}
  0x4c   :  { %s665_s10 = scalar_lea.vmem %s69_s17, 2048  ;;  %p670_p8 = scmp.lt.s32.totalorder %s69_s17, %s69_s17 }
  0x4d   :  { %p666_p7 = scmp.ne.s32.totalorder %s69_s17, %s665_s10  ;;  %p671_p9 = scmp.lt.s32.totalorder %s665_s10, %s665_s10 }
  0x4f   :  { %p672_p10 = por %p671_p9, %p670_p8 }
  0x51   :  { %p673_p11 = pnand %p672_p10, %p666_p7 }
  0x53   :  { %676 = shalt.err (!%p673_p11)
}
  0x54   :  { %74 = dma.hbm_to_vmem [thread:$0]  %s851_s4, 2048, %s69_s17, [#allocation9], %s712_s22, %s712_s22, %s713_s23  }
  0x55   :  { %699 = dma.done.wait [#allocation3], 128  }
  0x56   :  { %700 = vsyncadd [#allocation3], 4294967168 }
  0x57   :  { %701 = dma.done.wait [#allocation6], 384  }
  0x58   :  { %702 = vsyncadd [#allocation6], 4294966912 }
  0x59   :  { %703 = dma.done.wait [#allocation9], 4096  }
  0x5a   :  { %704 = vsyncadd [#allocation9], 4294963200  ;;  %v716_v0 = vmov 0.0   ;;  %vm717_vm0 = vmmov 0   ;;  %v565_v1 = vld [vmem:[#allocation5] sm:$0xff]   ;;  %v566_v2 = vld [vmem:[#allocation2] sm:$0xff]  }
  0x5b   :  { %411 = vmatprep.subr.bf16.mxu0 %v716_v0  ;;  %413 = vmatprep.mubr.msk.bf16.mxu0 %vm717_vm0, %v716_v0  ;;  %vm108_vm1 = vcmask 130048   ;;  %v171_v3 = vld [vmem:[#allocation10] sm:$0xff]  ;;  %v172_v4 = vld [vmem:[#allocation10 + $0x8] sm:$0xff]  ;;  %v173_v8 = vld [vmem:[#allocation10 + $0x10] sm:$0xff]  ;;  %s718_s12 = smov [#allocation11]  }
  0x5c   :  { %412 = vmatpush3.bf16.msra.mxu0 %v565_v1  ;;  %v153_v5 = vld [vmem:[#allocation8] sm:$0xff]  ;;  %v487_v6 = vpack.c.bf16 %v172_v4, %v171_v3  ;;  %v154_v7 = vld [vmem:[#allocation8 + $0x8] sm:$0xff]  ;;  %v174_v9 = vld [vmem:[#allocation10 + $0x18] sm:$0xff]  ;;  %s355_s13 = sshll.u32 %s718_s12, 4  ;;  %s356_s13 = int_to_ptr.vmem [resolvable:$true] %s355_s13 }
  0x5d   :  { %v519_v10 = vpack.c.bf16 %v154_v7, %v153_v5  ;;  %v491_v11 = vpack.c.bf16 %v174_v9, %v173_v8  ;;  %v155_v12 = vld [vmem:[#allocation8 + $0x10] sm:$0xff]  ;;  %v156_v13 = vld [vmem:[#allocation8 + $0x18] sm:$0xff]  ;;  %v175_v14 = vld [vmem:[#allocation10 + $0x20] sm:$0xff]  ;;  %s677_s15 = scalar_lea.vmem %s356_s13, 256  ;;  %p682_p13 = scmp.lt.s32.totalorder %s356_s13, %s356_s13 }
  0x5e   :  { %488 = vmatprep.subr.bf16.mxu0 %v487_v6  ;;  %v523_v15 = vpack.c.bf16 %v156_v13, %v155_v12  ;;  %v176_v16 = vld [vmem:[#allocation10 + $0x28] sm:$0xff]  ;;  %v157_v17 = vld [vmem:[#allocation8 + $0x20] sm:$0xff]  ;;  %v177_v21 = vld [vmem:[#allocation10 + $0x30] sm:$0xff]  ;;  %p678_p12 = scmp.ne.s32.totalorder %s356_s13, %s677_s15  ;;  %p683_p0 = scmp.lt.s32.totalorder %s677_s15, %s677_s15 }
  0x5f   :  { %414 = vmatmul.mubr.msk.bf16.vlgmr.msra.gmra.mrb[0].mxu0 %vm108_vm1, %v566_v2  ;;  %v158_v18 = vld [vmem:[#allocation8 + $0x28] sm:$0xff]  ;;  %520 = vmatprep.subr.bf16.mxu1 %v519_v10  ;;  %v495_v19 = vpack.c.bf16 %v176_v16, %v175_v14  ;;  %v178_v22 = vld [vmem:[#allocation10 + $0x38] sm:$0xff]  ;;  %v159_v23 = vld [vmem:[#allocation8 + $0x30] sm:$0xff] }
  0x60   :  { %490 = vmatpush3.bf16.msra.mxu0 %v487_v6  ;;  %522 = vmatpush3.bf16.msra.mxu1 %v519_v10  ;;  %v527_v20 = vpack.c.bf16 %v158_v18, %v157_v17  ;;  %v160_v24 = vld [vmem:[#allocation8 + $0x38] sm:$0xff]  ;;  %v499_v25 = vpack.c.bf16 %v178_v22, %v177_v21  ;;  %v179_v27 = vld [vmem:[#allocation10 + $0x40] sm:$0xff]  ;;  %v180_v28 = vld [vmem:[#allocation10 + $0x48] sm:$0xff]  ;;  %p684_p1 = por %p683_p0, %p682_p13 }
  0x61   :  { %492 = vmatprep.subr.bf16.mxu0 %v491_v11  ;;  %524 = vmatprep.subr.bf16.mxu1 %v523_v15  ;;  %v531_v26 = vpack.c.bf16 %v160_v24, %v159_v23  ;;  %v161_v29 = vld [vmem:[#allocation8 + $0x40] sm:$0xff]  ;;  %v162_v30 = vld [vmem:[#allocation8 + $0x48] sm:$0xff]  ;;  %v503_v31 = vpack.c.bf16 %v180_v28, %v179_v27  ;;  %v181_v33 = vld [vmem:[#allocation10 + $0x50] sm:$0xff] }
  0x62   :  { %v535_v32 = vpack.c.bf16 %v162_v30, %v161_v29  ;;  %v182_v34 = vld [vmem:[#allocation10 + $0x58] sm:$0xff]  ;;  %v163_v35 = vld [vmem:[#allocation8 + $0x50] sm:$0xff]  ;;  %v183_v39 = vld [vmem:[#allocation10 + $0x60] sm:$0xff]  ;;  %p685_p2 = pnand %p684_p1, %p678_p12 }
  0x63   :  { %v164_v36 = vld [vmem:[#allocation8 + $0x58] sm:$0xff]  ;;  %v507_v37 = vpack.c.bf16 %v182_v34, %v181_v33  ;;  %v184_v40 = vld [vmem:[#allocation10 + $0x68] sm:$0xff]  ;;  %v165_v41 = vld [vmem:[#allocation8 + $0x60] sm:$0xff] }
  0x64   :  { %494 = vmatpush3.bf16.msra.mxu0 %v491_v11  ;;  %526 = vmatpush3.bf16.msra.mxu1 %v523_v15  ;;  %v539_v38 = vpack.c.bf16 %v164_v36, %v163_v35  ;;  %v166_v42 = vld [vmem:[#allocation8 + $0x68] sm:$0xff]  ;;  %v511_v43 = vpack.c.bf16 %v184_v40, %v183_v39  ;;  %v185_v45 = vld [vmem:[#allocation10 + $0x70] sm:$0xff]  ;;  %v186_v46 = vld [vmem:[#allocation10 + $0x78] sm:$0xff] }
  0x65   :  { %496 = vmatprep.subr.bf16.mxu0 %v495_v19  ;;  %528 = vmatprep.subr.bf16.mxu1 %v527_v20  ;;  %v543_v44 = vpack.c.bf16 %v166_v42, %v165_v41  ;;  %v167_v47 = vld [vmem:[#allocation8 + $0x70] sm:$0xff]  ;;  %v168_v48 = vld [vmem:[#allocation8 + $0x78] sm:$0xff]  ;;  %v515_v49 = vpack.c.bf16 %v186_v46, %v185_v45  ;;  %v372_v60 = vld [vmem:[%s852_s5] ss:$0 sm:$0xff] }
  0x66   :  { %v547_v50 = vpack.c.bf16 %v168_v48, %v167_v47  ;;  %v169_v51 = vld [vmem:[#allocation7] sm:$0xff]  ;;  %v170_v52 = vld [vmem:[#allocation7 + $0x8] sm:$0xff] }
  0x67   :  { %449 = vmatprep.mubr.f32.mxu0 %v169_v51 }
  0x68   :  { %498 = vmatpush3.bf16.msra.mxu0 %v495_v19  ;;  %530 = vmatpush3.bf16.msra.mxu1 %v527_v20 }
  0x69   :  { %500 = vmatprep.subr.bf16.mxu0 %v499_v25  ;;  %532 = vmatprep.subr.bf16.mxu1 %v531_v26 }
  0x6c   :  { %502 = vmatpush3.bf16.msra.mxu0 %v499_v25  ;;  %534 = vmatpush3.bf16.msra.mxu1 %v531_v26 }
  0x6d   :  { %504 = vmatprep.subr.bf16.mxu0 %v503_v31  ;;  %536 = vmatprep.subr.bf16.mxu1 %v535_v32 }
  0x70   :  { %506 = vmatpush3.bf16.msra.mxu0 %v503_v31  ;;  %538 = vmatpush3.bf16.msra.mxu1 %v535_v32 }
  0x71   :  { %508 = vmatprep.subr.bf16.mxu0 %v507_v37  ;;  %540 = vmatprep.subr.bf16.mxu1 %v539_v38 }
  0x74   :  { %510 = vmatpush3.bf16.msra.mxu0 %v507_v37  ;;  %542 = vmatpush3.bf16.msra.mxu1 %v539_v38 }
  0x75   :  { %512 = vmatprep.subr.bf16.mxu0 %v511_v43  ;;  %544 = vmatprep.subr.bf16.mxu1 %v543_v44 }
  0x78   :  { %514 = vmatpush3.bf16.msra.mxu0 %v511_v43  ;;  %546 = vmatpush3.bf16.msra.mxu1 %v543_v44 }
  0x79   :  { %516 = vmatprep.subr.bf16.mxu0 %v515_v49  ;;  %548 = vmatprep.subr.bf16.mxu1 %v547_v50 }
  0x7c   :  { %518 = vmatpush3.bf16.msra.mxu0 %v515_v49  ;;  %550 = vmatpush3.bf16.msra.mxu1 %v547_v50 }
  0x7f   :  { %450 = vmatmul.mubr.f32.vlgmr.msra.gmra.mrb[4].mxu0 %v170_v52 }
 0x132   :  { %v146_v53 = vpop.f32.mrb[0].mxu0 }
 0x133   :  { %v415_v54 = vpop.f32.mrb[1].mxu0  ;;  %484 = vmatprep.mubr.f32.mxu1 %v146_v53 }
 0x134   :  { %v149_v55 = vpop.f32.mrb[2].mxu0 }
 0x135   :  { %v416_v56 = vpop.f32.mrb[3].mxu0  ;;  %485 = vmatmul.mubr.f32.vlgmr.msra.gmra.mrb[0].mxu1 %v149_v55 }
 0x152   :  { %v451_v57 = vpop.f32.mrb[4].mxu0 }
 0x153   :  { %v253_v58 = vpop.f32.mrb[5].mxu0 }
 0x208   :  { %v486_v59 = vpop.f32.mrb[0].mxu1 }
 0x209   :  { %v334_v61 = vadd.f32 %v486_v59, %v451_v57  ;;  %v328_v62 = vpop.f32.mrb[1].mxu1 }
 0x20a   :  { %v329_v63 = vadd.f32 %v328_v62, %v253_v58 }
 0x20b   :  { %v345_v0 = vadd.f32 %v372_v60, %v334_v61 }
 0x20c   :  { %v344_v1 = vadd.f32 %v372_v60, %v329_v63 }
 0x20d   :  { %v347_v2 = vmax.f32 %v345_v0, 0.0 }
 0x20e   :  { %v346_v3 = vmax.f32 %v344_v1, 0.0 }
 0x20f   :  { %349 = vst [vmem:[#allocation11 + $0x8] sm:$0xff] %v347_v2 }
 0x210   :  { %348 = vst [vmem:[#allocation11] sm:$0xff] %v346_v3 }
 0x211   :  { %688 = shalt.err (!%p685_p2)
}
 0x212   :  { %s689_s17 = scalar_lea.hbm %s853_s6, 256 }
 0x213   :  { %p690_p3 = scmp.ne.s32.totalorder %s853_s6, %s689_s17  ;;  %p693_p4 = scmp.lt.u32.totalorder %s689_s17, %s853_s6 }
 0x215   :  { %p695_p5 = pnand %p693_p4, %p690_p3 }
 0x217   :  { %698 = shalt.err (!%p695_p5)
}
 0x218   :  { %361 = dma.vmem_to_hbm [thread:$0]  %s356_s13, 256, %s853_s6, [#allocation4], %s712_s22, %s712_s22, %s713_s23  }
 0x219   :  { %705 = dma.done.wait [#allocation4], 256  }
 0x21a   :  { %706 = vsyncadd [#allocation4], 4294967040 }
 0x21b   :  { %365 = vsyncpa [#allocation3], 1 }
 0x21c   :  { %366 = vsyncpa [#allocation6], 1 }
 0x21d   :  { %367 = vsyncpa [#allocation9], 1 }
 0x21e   :  { %368 = vsyncpa [#allocation4], 1 }

</bundles_post_ra>
